<compile_context>
chip_gen: v7x
topology: tpu7x:2x2x1
jax: 0.10.0
libtpu: 0.0.40
codegen_flags: <defaults>
</compile_context>

<pallas_src>
import functools

import jax
import jax.numpy as jnp
from jax.experimental import pallas as pl
from jax.experimental.pallas import tpu as pltpu

F32 = jnp.float32
BF16 = jnp.bfloat16
NEG_SLOPE = 0.01           # nn.LeakyReLU() default
BN_EPS = 1e-5
VMEM_LIMIT = 32 * 1024 * 1024


def _round_up(x, m):
    return (x + m - 1) // m * m


def _act_fn(y, act):
    if act == "none":
        return y
    if act == "relu":
        return jnp.maximum(y, 0.0)
    if act == "lrelu":
        return jnp.where(y > 0, y, NEG_SLOPE * y)
    if act == "tanh":
        return jnp.tanh(y)
    raise ValueError(act)


# ---------------------------------------------------------------------------
# Pallas kernels
# ---------------------------------------------------------------------------
def _mm_kernel(a_ref, b_ref, bias_ref, o_ref, acc_ref, *, act, nk):
    part = jnp.dot(a_ref[...], b_ref[...], preferred_element_type=jnp.float32)
    if nk == 1:
        # fast path: single store, no accumulator round trip
        o_ref[...] = _act_fn(part + bias_ref[...], act).astype(o_ref.dtype)
    else:
        k = pl.program_id(2)

        @pl.when(k == 0)
        def _():
            acc_ref[...] = part + bias_ref[...]      # bias folded into init

        @pl.when(k > 0)
        def _():
            acc_ref[...] += part

        @pl.when(k == nk - 1)
        def _():
            o_ref[...] = _act_fn(acc_ref[...], act).astype(o_ref.dtype)


def _mm_stats_kernel(a_ref, b_ref, o_ref, sum_ref, sq_ref, acc_ref, *, nk):
    """Matmul (no bias / no act) that also emits per-column sum and sum-of-
    squares for a following BatchNorm - stats accumulate in f32."""
    part = jnp.dot(a_ref[...], b_ref[...], preferred_element_type=jnp.float32)
    if nk == 1:
        o_ref[...] = part.astype(o_ref.dtype)
        sum_ref[...] = jnp.sum(part, axis=0, keepdims=True)[None]
        sq_ref[...] = jnp.sum(part * part, axis=0, keepdims=True)[None]
    else:
        k = pl.program_id(2)

        @pl.when(k == 0)
        def _():
            acc_ref[...] = part

        @pl.when(k > 0)
        def _():
            acc_ref[...] += part

        @pl.when(k == nk - 1)
        def _():
            acc = acc_ref[...]
            o_ref[...] = acc.astype(o_ref.dtype)
            sum_ref[...] = jnp.sum(acc, axis=0, keepdims=True)[None]
            sq_ref[...] = jnp.sum(acc * acc, axis=0, keepdims=True)[None]


def matmul_bias_act(a, b, bias, act, compute_stats=False):
    """act(a @ b + bias): bf16 operands, f32 accumulation, bf16 output.
    If compute_stats (requires bias None and act 'none'), also returns the
    per-column mean and mean-of-squares fused into the matmul epilogue."""
    M, K = a.shape
    N = b.shape[1]
    if compute_stats:
        assert bias is None and act == "none"
    a = a.astype(BF16)
    b = b.astype(BF16)

    # N (lane) tile: pad tiny Cout up to 128 so stores stay lane-dense.
    if N < 128:
        TN, Np = 128, 128
    elif N <= 256:
        TN, Np = N, N
    else:
        TN = 256 if N % 256 == 0 else 128
        Np = _round_up(N, TN)
    # K tile: full-dim block when small -> no pad round trip.
    if K <= 2048:
        TK, Kp = K, K
    else:
        TK = 512 if K % 512 == 0 else (256 if K % 256 == 0 else 128)
        Kp = _round_up(K, TK)
    # M tile.
    if M <= 512:
        TM = _round_up(max(M, 8), 8)
    else:
        TM = 512 if M % 512 == 0 else (256 if M % 256 == 0 else 128)
    # v7x: make sure there are >=2 blocks along a parallel axis when possible.
    if (_round_up(M, TM) // TM) * (Np // TN) < 2 and TM >= 32:
        TM = _round_up(TM // 2, 16)
    Mp = _round_up(M, TM)

    if Mp != M or Kp != K:
        a = jnp.pad(a, ((0, Mp - M), (0, Kp - K)))
    if Kp != K or Np != N:
        b = jnp.pad(b, ((0, Kp - K), (0, Np - N)))

    nk = Kp // TK
    gm, gn = Mp // TM, Np // TN
    a_spec = pl.BlockSpec((TM, TK), lambda i, j, k: (i, k))
    b_spec = pl.BlockSpec((TK, TN), lambda i, j, k: (k, j))
    o_spec = pl.BlockSpec((TM, TN), lambda i, j, k: (i, j))
    cparams = pltpu.CompilerParams(
        dimension_semantics=("parallel", "parallel", "arbitrary"),
        vmem_limit_bytes=VMEM_LIMIT)
    scratch = [pltpu.VMEM((TM, TN), F32)]

    if compute_stats:
        s_spec = pl.BlockSpec((1, 1, TN), lambda i, j, k: (i, 0, j))
        out, sums, sqs = pl.pallas_call(
            functools.partial(_mm_stats_kernel, nk=nk),
            out_shape=(jax.ShapeDtypeStruct((Mp, Np), BF16),
                       jax.ShapeDtypeStruct((gm, 1, Np), F32),
                       jax.ShapeDtypeStruct((gm, 1, Np), F32)),
            grid=(gm, gn, nk),
            in_specs=[a_spec, b_spec],
            out_specs=(o_spec, s_spec, s_spec),
            scratch_shapes=scratch,
            compiler_params=cparams,
        )(a, b)
        if Mp != M or Np != N:
            out = out[:M, :N]
        col_mean = jnp.sum(sums[:, 0, :N], axis=0) / M
        col_msq = jnp.sum(sqs[:, 0, :N], axis=0) / M
        return out, col_mean, col_msq

    bias_p = (jnp.zeros((Np,), F32) if bias is None
              else jnp.pad(bias.astype(F32), (0, Np - N))).reshape(1, Np)
    out = pl.pallas_call(
        functools.partial(_mm_kernel, act=act, nk=nk),
        out_shape=jax.ShapeDtypeStruct((Mp, Np), BF16),
        grid=(gm, gn, nk),
        in_specs=[a_spec, b_spec,
                  pl.BlockSpec((1, TN), lambda i, j, k: (0, j))],
        out_specs=o_spec,
        scratch_shapes=scratch,
        compiler_params=cparams,
    )(a, b, bias_p)
    if Mp != M or Np != N:
        out = out[:M, :N]
    return out


def _affine_kernel(x_ref, s_ref, t_ref, o_ref, *, act):
    y = x_ref[...].astype(jnp.float32) * s_ref[...] + t_ref[...]
    o_ref[...] = _act_fn(y, act).astype(o_ref.dtype)


def _affine_res_kernel(x_ref, r_ref, s_ref, t_ref, o_ref, *, act):
    y = (x_ref[...].astype(jnp.float32) * s_ref[...] + t_ref[...]
         + r_ref[...].astype(jnp.float32))
    o_ref[...] = _act_fn(y, act).astype(o_ref.dtype)


def batchnorm_affine_act(x, mean, var, act, residual=None):
    """(x - mean) * rsqrt(var+eps) + activation (+ optional residual), applied
    on a lane-dense (N*H, W*C) view.  bf16 in/out, f32 math."""
    N, H, W, C = x.shape
    scale = jax.lax.rsqrt(var.astype(F32) + BN_EPS)
    shift = -mean.astype(F32) * scale
    R, L = N * H, W * C                        # L is a multiple of 128 here
    xf = x.astype(BF16).reshape(R, L)
    s = jnp.tile(scale, W).reshape(1, L)
    t = jnp.tile(shift, W).reshape(1, L)
    TR = R if R <= 128 else 128
    Rp = _round_up(R, TR)
    if Rp != R:
        xf = jnp.pad(xf, ((0, Rp - R), (0, 0)))

    row_spec = pl.BlockSpec((TR, L), lambda i: (i, 0))
    vec_spec = pl.BlockSpec((1, L), lambda i: (0, 0))
    cparams = pltpu.CompilerParams(dimension_semantics=("parallel",),
                                   vmem_limit_bytes=VMEM_LIMIT)
    if residual is None:
        out = pl.pallas_call(
            functools.partial(_affine_kernel, act=act),
            out_shape=jax.ShapeDtypeStruct((Rp, L), BF16),
            grid=(Rp // TR,),
            in_specs=[row_spec, vec_spec, vec_spec],
            out_specs=row_spec,
            compiler_params=cparams)(xf, s, t)
    else:
        rf = residual.astype(BF16).reshape(R, L)
        if Rp != R:
            rf = jnp.pad(rf, ((0, Rp - R), (0, 0)))
        out = pl.pallas_call(
            functools.partial(_affine_res_kernel, act=act),
            out_shape=jax.ShapeDtypeStruct((Rp, L), BF16),
            grid=(Rp // TR,),
            in_specs=[row_spec, row_spec, vec_spec, vec_spec],
            out_specs=row_spec,
            compiler_params=cparams)(xf, rf, s, t)
    if Rp != R:
        out = out[:R]
    return out.reshape(N, H, W, C)


# ---------------------------------------------------------------------------
# Convolution wrappers (im2col glue + Pallas matmul)
# ---------------------------------------------------------------------------
def conv2d(x, w, b, stride=1, padding=0, pad_mode="zero", act="none",
           compute_stats=False):
    """x: (N,H,W,Cin), w: (KH,KW,Cin,Cout) HWIO, b: (Cout,) or None."""
    N, H, W, Cin = x.shape
    KH, KW, _, Cout = w.shape
    x = x.astype(BF16)
    if padding > 0:
        mode = "reflect" if pad_mode == "reflect" else "constant"
        x = jnp.pad(x, ((0, 0), (padding, padding), (padding, padding), (0, 0)),
                    mode=mode)
    Hp, Wp = x.shape[1], x.shape[2]
    Ho = (Hp - KH) // stride + 1
    Wo = (Wp - KW) // stride + 1
    # TODO(synk): patches are still materialised by XLA slicing/concat (bf16);
    # an implicit-GEMM Pallas conv (taps on the k grid axis reading shifted
    # VMEM windows) would remove this KH*KW x HBM blow-up entirely.
    cols = []
    for dh in range(KH):
        for dw in range(KW):
            cols.append(x[:, dh:dh + stride * (Ho - 1) + 1:stride,
                          dw:dw + stride * (Wo - 1) + 1:stride, :])
    patches = jnp.concatenate(cols, axis=-1).reshape(N * Ho * Wo, KH * KW * Cin)
    res = matmul_bias_act(patches, w.reshape(KH * KW * Cin, Cout), b, act,
                          compute_stats=compute_stats)
    if compute_stats:
        out, col_mean, col_msq = res
        return out.reshape(N, Ho, Wo, Cout), col_mean, col_msq
    return res.reshape(N, Ho, Wo, Cout)


def conv_bn_act(x, w, stride, padding, pad_mode, act, residual=None):
    """Conv (no bias) -> BatchNorm2d (train-mode batch stats, gamma=1, beta=0)
    -> activation, with BN statistics fused into the matmul epilogue."""
    y, m, msq = conv2d(x, w, None, stride, padding, pad_mode, "none",
                       compute_stats=True)
    var = jnp.maximum(msq - m * m, 0.0)
    return batchnorm_affine_act(y, m, var, act, residual)


def _phase_taps(K, padding):
    """Per output phase a in {0,1}: list of (kernel_tap, input_offset) for a
    stride-2 transposed conv written as conv over the zero-dilated input."""
    P = K - 1 - padding
    phases = []
    for a in (0, 1):
        phases.append([(dh, (a + dh - P) // 2) for dh in range(K)
                       if (a + dh - P) % 2 == 0])
    return phases


def _phase_kernel(w, padding):
    """Combine a stride-2 transposed-conv kernel (fwd-equivalent HWIO form)
    into one stride-1 kernel producing 4*Cout sub-pixel-phase channels."""
    K, _, Cin, Cout = w.shape
    phases = _phase_taps(K, padding)
    offs = [o for taps in phases for _, o in taps]
    omin, omax = min(offs), max(offs)
    kk = omax - omin + 1
    wc = jnp.zeros((kk, kk, Cin, 4, Cout), w.dtype)
    for a in (0, 1):
        for bb in (0, 1):
            for dh, oh in phases[a]:
                for dw, ow in phases[bb]:
                    wc = wc.at[oh - omin, ow - omin, :, 2 * a + bb, :].set(w[dh, dw])
    return wc.reshape(kk, kk, Cin, 4 * Cout), omin, omax


def _pixel_shuffle2(y4, Cout):
    N, H, W, _ = y4.shape
    # TODO(synk): the shuffle is still an XLA transpose (now bf16); folding it
    # into the matmul output BlockSpec would save one HBM round trip/upsample.
    y = y4.reshape(N, H, W, 2, 2, Cout).transpose(0, 1, 3, 2, 4, 5)
    return y.reshape(N, 2 * H, 2 * W, Cout)


def conv_transpose2d_s2(x, w, b, padding, output_padding, act="none",
                        bn_relu=False):
    """nn.ConvTranspose2d (stride 2) via sub-pixel phase decomposition: a
    single stride-1 conv producing 4*Cout channels + pixel shuffle.  `w` is
    stored in equivalent-forward-conv HWIO form (weights here are synthetic)."""
    N, H, W, Cin = x.shape
    K, Cout = w.shape[0], w.shape[3]
    assert (H - 1) * 2 - 2 * padding + K + output_padding == 2 * H, \
        "phase decomposition assumes Hout == 2*Hin"
    wc, omin, omax = _phase_kernel(w, padding)
    xpad = jnp.pad(x.astype(BF16),
                   ((0, 0), (-omin, omax), (-omin, omax), (0, 0)))
    if bn_relu:
        # BN + ReLU applied pre-shuffle (elementwise, so order is equivalent);
        # per-channel stats combine the 4 phase groups.
        y4, m, msq = conv2d(xpad, wc, None, 1, 0, act="none",
                            compute_stats=True)
        m = m.reshape(4, Cout).mean(axis=0)
        msq = msq.reshape(4, Cout).mean(axis=0)
        var = jnp.maximum(msq - m * m, 0.0)
        y4 = batchnorm_affine_act(y4, jnp.tile(m, 4), jnp.tile(var, 4), "relu")
    else:
        bias4 = None if b is None else jnp.tile(b, 4)
        y4 = conv2d(xpad, wc, bias4, 1, 0, act=act)
    return _pixel_shuffle2(y4, Cout)


# ---------------------------------------------------------------------------
# The numpy "scramble" (operates on the first two axes of NCHW, i.e.
# batch/channel).  For batch=1 / channels=3 every loop range is empty, so it is
# a no-op, exactly like the reference.
# TODO(synk): reference does a host-numpy/.cuda() round trip here.
# ---------------------------------------------------------------------------
def scramble_blocks(img_nchw):
    block_size = 10
    xres, yres = img_nchw.shape[0], img_nchw.shape[1]
    arr = img_nchw
    for i in range(2, block_size + 1):
        for j in range(xres // i):
            for k in range(yres // i):
                blk = arr[j * i:(j + 1) * i, k * i:(k + 1) * i]
                arr = arr.at[j * i:(j + 1) * i, k * i:(k + 1) * i].set(
                    jnp.flip(blk, axis=(0, 1)))                  # np.rot90(block, 2)
    for i in range(3, block_size + 1):
        s = block_size + 2 - i
        for j in range(xres // s):
            for k in range(yres // s):
                blk = arr[j * s:(j + 1) * s, k * s:(k + 1) * s]
                arr = arr.at[j * s:(j + 1) * s, k * s:(k + 1) * s].set(
                    jnp.flip(blk, axis=(0, 1)))
    return arr


# ---------------------------------------------------------------------------
# Deterministic parameter construction (synthetic weights)
# ---------------------------------------------------------------------------
class KeyGen:
    def __init__(self, seed):
        self._key = jax.random.PRNGKey(seed)

    def __call__(self):
        self._key, sub = jax.random.split(self._key)
        return sub


def _conv_p(kg, k, cin, cout, bias):
    p = {"w": 0.02 * jax.random.normal(kg(), (k, k, cin, cout), F32)}
    p["b"] = 0.02 * jax.random.normal(kg(), (cout,), F32) if bias else None
    return p


def _resblock_p(kg, dim):
    # norm_layer = BatchNorm2d -> use_bias = False inside ResnetBlock convs
    return {"c1": _conv_p(kg, 3, dim, dim, False),
            "c2": _conv_p(kg, 3, dim, dim, False)}


def _head_p(kg, ngf):
    return {"c7": _conv_p(kg, 7, 3, ngf, False),
            "downs": [_conv_p(kg, 3, ngf, ngf * 2, False),
                      _conv_p(kg, 3, ngf * 2, ngf * 4, False)]}


def _tail_p(kg, ngf, out_ch):
    return {"ups": [_conv_p(kg, 3, ngf * 4, ngf * 2, False),
                    _conv_p(kg, 3, ngf * 2, ngf, False)],
            "final": _conv_p(kg, 7, ngf, out_ch, True)}


def _g3_p(kg):
    down = [(3, 64), (64, 128), (128, 256), (256, 512),
            (512, 512), (512, 512), (512, 512), (512, 512)]
    up = [(512, 512), (1024, 512), (1024, 512), (1024, 512),
          (1024, 256), (512, 128), (256, 64), (128, 3)]
    return {"down": [_conv_p(kg, 4, ci, co, True) for ci, co in down],
            "up": [_conv_p(kg, 4, ci, co, True) for ci, co in up]}


def build_params(seed, ngf, n_blocks):
    kg = KeyGen(seed)
    dim = ngf * 4
    return {
        "pre1": {**_head_p(kg, ngf),
                 "blocks": [_resblock_p(kg, dim) for _ in range(n_blocks)],
                 **_tail_p(kg, ngf, 3)},
        "model": {**_head_p(kg, ngf),
                  "blocks": [_resblock_p(kg, dim) for _ in range(4)]},   # pre_f_blocks=4
        "pre": {"blocks": [_resblock_p(kg, dim) for _ in range(3)]},     # blocks 4..6
        # range(pre_l_blocks=7, n_blocks) is empty -> post heads have no resblocks
        "post1": _tail_p(kg, ngf, 1),
        "post2": _tail_p(kg, ngf, 1),
        "g3": _g3_p(kg),
    }


# ---------------------------------------------------------------------------
# Forward passes
# ---------------------------------------------------------------------------
def resnet_block_fwd(x, p):
    h = conv_bn_act(x, p["c1"]["w"], 1, 1, "reflect", "relu")
    return conv_bn_act(h, p["c2"]["w"], 1, 1, "reflect", "none", residual=x)


def run_head(x, p):
    h = conv_bn_act(x, p["c7"]["w"], 1, 3, "reflect", "relu")
    for d in p["downs"]:
        h = conv_bn_act(h, d["w"], 2, 1, "zero", "relu")
    return h


def run_blocks(h, blocks):
    for bp in blocks:
        h = resnet_block_fwd(h, bp)
    return h


def run_tail(h, p):
    for u in p["ups"]:
        h = conv_transpose2d_s2(h, u["w"], None, 1, 1, bn_relu=True)
    return conv2d(h, p["final"]["w"], p["final"]["b"], 1, 3,
                  pad_mode="reflect", act="tanh")


def g3_forward(x, p):
    downs = []
    h = x
    acts = ["lrelu"] * 7 + ["relu"]
    for i in range(8):
        c = p["down"][i]
        h = conv2d(h, c["w"], c["b"], 2, 1, act=acts[i])
        downs.append(h)
    u = p["up"][0]
    h = conv_transpose2d_s2(downs[7], u["w"], u["b"], 1, 0, act="relu")
    # TODO(synk): skip concats are still materialised (bf16); feeding the up
    # matmuls two K-segments would avoid these copies.
    h = jnp.concatenate([h, downs[6]], axis=-1)
    for i in range(1, 7):
        u = p["up"][i]
        h = conv_transpose2d_s2(h, u["w"], u["b"], 1, 0, act="relu")
        h = jnp.concatenate([h, downs[6 - i]], axis=-1)
    u = p["up"][7]
    return conv_transpose2d_s2(h, u["w"], u["b"], 1, 0, act="tanh")


def forward(params, x_nchw):
    x = jnp.transpose(x_nchw, (0, 2, 3, 1))                       # NCHW -> NHWC
    # model_pre1
    h = run_head(x, params["pre1"])
    h = run_blocks(h, params["pre1"]["blocks"])
    scrambled = run_tail(h, params["pre1"])                       # (N,H,W,3), tanh
    scrambled_nchw = jnp.transpose(scrambled, (0, 3, 1, 2)).astype(F32)
    intermediate = scramble_blocks(scrambled_nchw)                # NCHW
    inter_nhwc = jnp.transpose(intermediate, (0, 2, 3, 1))
    # model -> latent
    latent = run_blocks(run_head(inter_nhwc, params["model"]),
                        params["model"]["blocks"])
    # model_pre -> fuse_ip
    fuse = run_blocks(latent, params["pre"]["blocks"])
    # model_post1 / model_post2
    io1 = run_tail(fuse, params["post1"])                         # (N,H,W,1)
    io2 = run_tail(fuse, params["post2"])
    # TODO(synk): the reference feeds the 1-channel model_post* output into G3
    # whose first Conv2d expects 3 input channels (would raise in PyTorch); the
    # single channel is tiled to 3 so the G3 U-Net can run.
    # Both G3 passes share weights -> run once on a batch of 2.
    nb = io1.shape[0]
    g3_in = jnp.concatenate([jnp.tile(io1, (1, 1, 1, 3)),
                             jnp.tile(io2, (1, 1, 1, 3))], axis=0)
    g3_out = g3_forward(g3_in, params["g3"])
    out1, out2 = g3_out[:nb], g3_out[nb:]
    to_nchw = lambda t: jnp.transpose(t, (0, 3, 1, 2)).astype(F32)
    return (to_nchw(io1), to_nchw(io2), to_nchw(out1), to_nchw(out2),
            to_nchw(latent), intermediate)


# ---------------------------------------------------------------------------
# Small correctness self-test (bf16 Pallas conv vs f32 lax conv, explicit tol)
# ---------------------------------------------------------------------------
def _self_test():
    k1, k2, k3, k4, k5 = jax.random.split(jax.random.PRNGKey(1), 5)
    x = jax.random.normal(k1, (1, 12, 12, 8), F32)
    w = 0.05 * jax.random.normal(k2, (3, 3, 8, 16), F32)
    b = 0.05 * jax.random.normal(k3, (16,), F32)
    for stride in (1, 2):
        got = conv2d(x, w, b, stride=stride, padding=1).astype(F32)
        ref = jax.lax.conv_general_dilated(
            x, w, (stride, stride), ((1, 1), (1, 1)),
            dimension_numbers=("NHWC", "HWIO", "NHWC")) + b
        assert float(jnp.max(jnp.abs(got - ref))) < 5e-2, "conv2d mismatch"
    xt = jax.random.normal(k4, (1, 8, 8, 8), F32)
    for K, pad, opad in ((4, 1, 0), (3, 1, 1)):
        wt = 0.05 * jax.random.normal(k5, (K, K, 8, 8), F32)
        got = conv_transpose2d_s2(xt, wt, None, pad, opad).astype(F32)
        P = K - 1 - pad
        ref = jax.lax.conv_general_dilated(
            xt, wt, (1, 1), ((P, P + opad), (P, P + opad)),
            lhs_dilation=(2, 2),
            dimension_numbers=("NHWC", "HWIO", "NHWC"))
        assert float(jnp.max(jnp.abs(got - ref))) < 5e-2, "conv_transpose mismatch"


if __name__ == "__main__":
    _self_test()

    # ResnetGeneratorMMReverse(input_nc=3, output_nc=3, ngf=8, n_blocks=1).
    # Spatial size 256 is the smallest the reference admits: G3 performs eight
    # stride-2 4x4 downsamples and concatenates skip connections.  Channel
    # widths / block counts are kept minimal to stay well inside the sandbox
    # time budget.
    NGF, N_BLOCKS = 8, 1
    params = build_params(seed=0, ngf=NGF, n_blocks=N_BLOCKS)
    x = jax.random.normal(jax.random.PRNGKey(0), (1, 3, 256, 256), F32)

    fwd = jax.jit(forward)
    outs = fwd(params, x)
    jax.block_until_ready(outs)

    io1, io2, o1, o2, latent, inter = outs
    assert io1.shape == (1, 1, 256, 256) and io2.shape == (1, 1, 256, 256)
    assert o1.shape == (1, 3, 256, 256) and o2.shape == (1, 3, 256, 256)
    assert latent.shape == (1, NGF * 4, 64, 64) and inter.shape == (1, 3, 256, 256)
    assert all(bool(jnp.isfinite(t).all()) for t in (io1, io2, o1, o2, latent, inter))
    assert bool((jnp.abs(io1) <= 1.0 + 1e-3).all()) and bool((jnp.abs(o1) <= 1.0 + 1e-3).all())
    print("KERNEL_OK")
</pallas_src>

<mosaic_0001>
module attributes {stable_mosaic.version = 11 : i64} {
  func.func @_mm_kernel(%arg0: i32, %arg1: i32, %arg2: i32, %arg3: memref<80x72xbf16, #tpu.memory_space<vmem>>, %arg4: memref<72x128xbf16, #tpu.memory_space<vmem>>, %arg5: memref<1x128xf32, #tpu.memory_space<vmem>>, %arg6: memref<80x128xbf16, #tpu.memory_space<vmem>>, %arg7: memref<80x128xf32, #tpu.memory_space<vmem>>) attributes {dimension_semantics = [#tpu.dimension_semantics<parallel>, #tpu.dimension_semantics<parallel>, #tpu.dimension_semantics<arbitrary>], iteration_bounds = array<i64: 2, 1, 1>, scalar_prefetch = 0 : i64, scratch_operands = 1 : i64, tpu.core_type = #tpu.core_type<tc>, window_params = [{transform_indices = @transform_0, window_bounds = array<i64: 80, 72>}, {transform_indices = @transform_1, window_bounds = array<i64: 72, 128>}, {transform_indices = @transform_2, window_bounds = array<i64: 1, 128>}, {transform_indices = @transform_3, window_bounds = array<i64: 80, 128>}]} {
    %c0 = arith.constant 0 : index
    %c0_0 = arith.constant 0 : index
    %0 = vector.load %arg3[%c0, %c0_0] : memref<80x72xbf16, #tpu.memory_space<vmem>>, vector<80x72xbf16>
    %c0_1 = arith.constant 0 : index
    %c0_2 = arith.constant 0 : index
    %1 = vector.load %arg4[%c0_1, %c0_2] : memref<72x128xbf16, #tpu.memory_space<vmem>>, vector<72x128xbf16>
    %cst = arith.constant dense<0.000000e+00> : vector<80x128xf32>
    %2 = tpu.matmul %0, %1, %cst {dimension_numbers = #tpu.dot_dimension_numbers<[1], [0], [0], [1], [0, 0, 1, 1], [], []>} : vector<80x72xbf16>, vector<72x128xbf16>, vector<80x128xf32> -> vector<80x128xf32>
    %c0_3 = arith.constant 0 : index
    %c0_4 = arith.constant 0 : index
    %3 = vector.load %arg5[%c0_3, %c0_4] : memref<1x128xf32, #tpu.memory_space<vmem>>, vector<1x128xf32>
    %4 = vector.broadcast %3 : vector<1x128xf32> to vector<80x128xf32>
    %5 = arith.addf %2, %4 : vector<80x128xf32>
    %6 = arith.truncf %5 : vector<80x128xf32> to vector<80x128xbf16>
    %c0_5 = arith.constant 0 : index
    %c0_6 = arith.constant 0 : index
    %7 = vector.load %arg6[%c0_5, %c0_6] : memref<80x128xbf16, #tpu.memory_space<vmem>>, vector<80x128xbf16>
    tpu.vector_store %arg6[%c0_5, %c0_6], %6 {strides = array<i32>} : memref<80x128xbf16, #tpu.memory_space<vmem>>, vector<80x128xbf16>,
    return
  }
  func.func @transform_0(%arg0: i32, %arg1: i32, %arg2: i32) -> (i32, i32) {
    %c0_i32 = arith.constant 0 : i32
    return %arg0, %arg2 : i32, i32
  }
  func.func @transform_1(%arg0: i32, %arg1: i32, %arg2: i32) -> (i32, i32) {
    %c0_i32 = arith.constant 0 : i32
    return %arg2, %arg1 : i32, i32
  }
  func.func @transform_2(%arg0: i32, %arg1: i32, %arg2: i32) -> (i32, i32) {
    %c0_i32 = arith.constant 0 : i32
    %c0_i32_0 = arith.constant 0 : i32
    return %c0_i32, %arg1 : i32, i32
  }
  func.func @transform_3(%arg0: i32, %arg1: i32, %arg2: i32) -> (i32, i32) {
    %c0_i32 = arith.constant 0 : i32
    return %arg0, %arg1 : i32, i32
  }
}

</mosaic_0001>

<bundles_post_ra>
// kernel: tpu_custom_call.1
= control target key start
LH: loop header
LB: loop body
LE: loop exit
PB: predicated region body
PF: predicated region fallthrough
CT: control target
= control target key end

     0   :  { %8 = vsyncpa [#allocation4], 0  ;;  %s1047_s0 = inlined_call_operand.vmem [shape: bf16[160,72], index: 0, kind: input, shape index: {}]   ;;  %s1048_s1 = inlined_call_operand.vmem [shape: bf16[72,128], index: 1, kind: input, shape index: {}]   ;;  %s1049_s2 = inlined_call_operand.vmem [shape: f32[1,128], index: 2, kind: input, shape index: {}]   ;;  %s1050_s3 = inlined_call_operand.hbm [shape: bf16[160,128], index: 3, kind: output, shape index: {}]  }
   0x1   :  { %10 = vsyncpa [#allocation4 + $0x1], 0  ;;  %s898_s12 = smov 0   ;;  %s900_s13 = smov 0  }
   0x2   :  { %s902_s14 = smov 0   ;;  %s904_s15 = smov 0  }
   0x3   :  { %s906_s16 = smov 0   ;;  %s908_s17 = smov 0  }
   0x4 LB: > { %s596_s18 = sadd.s32 4294967295, %s871_s17   ;;  %s597_s19 = sadd.s32 4294967294, %s871_s17   ;;  %s871_s17 = sphi %s908_s17, %s16_s17   ;;  %s867_s16 = sphi %s906_s16, %s1057_s16   ;;  %s863_s15 = sphi %s904_s15, %s1056_s15   ;;  %s859_s14 = sphi %s902_s14, %s1055_s14   ;;  %s855_s13 = sphi %s900_s13, %s1054_s13   ;;  %s851_s12 = sphi %s898_s12, %s1053_s12  }
   0x5   : > { %s35_s20 = sadd.s32 1, %s867_s16  ;;  %s126_s21 = sadd.s32 1, %s859_s14 }
   0x6   : > { %p37_p0 = scmp.ge.s32.totalorder %s35_s20, 2  ;;  %p136_p1 = scmp.ne.s32.totalorder %s859_s14, %s855_s13 }
   0x7   : > { %p137_p2 = scmp.eq.s32.totalorder %s596_s18, 1  ;;  %p142_p3 = scmp.ne.s32.totalorder %s855_s13, %s851_s12 }
   0x8   : > { %s1059_s20 = smov (%p37_p0, %s35_s20), 0  ;;  %p143_p5 = scmp.eq.s32.totalorder %s597_s19, 1 }
   0x9   : > { %p938_p4 = por %p137_p2, %p136_p1  ;;  %s121_s23 = ssub.s32 %s867_s16, %s1059_s20 }
   0xa   : > { %p602_p6 = scmp.ge.s32.totalorder %s871_s17, 1  ;;  %p124_p7 = scmp.eq.s32.totalorder %s121_s23, 0 }
   0xb   : > { %p945_p8 = por %p143_p5, %p142_p3  ;;  %p191_p9 = scmp.lt.s32.totalorder %s871_s17, 3 }
   0xc   : > { %s951_s25 = scalar_select %p124_p7, %s859_s14, %s126_s21  }
   0xd   : > { %p192_p10 = pnand %p602_p6, %p191_p9 }
   0xe   : > { %v783_v0 = vld [vmem:[%s1048_s1] sm:$0xff] (!%p192_p10)   ;;  %v873_v1 = vmov (!%p192_p10), 0.0   ;;  %v784_v2 = vld [vmem:[%s1048_s1 + $0x8] sm:$0xff] (!%p192_p10)   ;;  %s229_s30 = smul.u32 (!%p192_p10), 10, %s863_s15  ;;  %vm874_vm0 = vmmov (!%p192_p10), 0   ;;  %v785_v3 = vld [vmem:[%s1048_s1 + $0x10] sm:$0xff] (!%p192_p10)  }
   0xf   : > { %195 = sbr.rel (%p192_p10) target bundleno = 284 (0x11c), region = 32  ;;  %683 = vmatprep.subr.bf16.mxu0 (!%p192_p10), %v873_v1  ;;  %713 = vmatprep.subr.bf16.mxu1 (!%p192_p10), %v873_v1  ;;  %v786_v4 = vld [vmem:[%s1048_s1 + $0x18] sm:$0xff] (!%p192_p10)   ;;  %v787_v5 = vld [vmem:[%s1048_s1 + $0x20] ss:$0 sps:$4 sm:$0xff] (!%p192_p10)   ;;  %vm346_vm1 = vcmask (!%p192_p10), 1043456   ;;  %vm330_vm2 = vcmask (!%p192_p10), 588800  }
  0x10   : > { %684 = vmatpush3.bf16.msra.mxu0 (!%p192_p10), %v783_v0  ;;  %718 = vmatpush3.bf16.msra.mxu1 (!%p192_p10), %v783_v0  ;;  %p230_p11 = scmp.lt.s32.totalorder (!%p192_p10), %s229_s30, 19  ;;  %v348_v6 = vsel (!%p192_p10), %vm346_vm1, %v787_v5, 0  ;;  %s226_s21 = sand.u32 (!%p192_p10), 1, %s855_s13   ;;  %v604_v12 = vld [vmem:[%s1049_s2] ss:$0 sm:$0xff] (!%p192_p10) }
  0x11   : > { %685 = vmatprep.subr.bf16.mxu0 (!%p192_p10), %v873_v1  ;;  %714 = vmatprep.subr.bf16.mxu1 (!%p192_p10), %v873_v1  ;;  %s723_s27 = smul.u32 (!%p192_p10), 40, %s226_s21  ;;  %s875_s8 = smov (!%p192_p10), [#allocation3]  }
  0x12   : > { %693 = vmatprep.mubr.msk.bf16.mxu0 (!%p192_p10), %vm874_vm0, %v873_v1  ;;  %705 = vmatprep.mubr.msk.bf16.mxu1 (!%p192_p10), %vm874_vm0, %v873_v1  ;;  %s643_s29 = smul.u32 (!%p192_p10), 640, %s863_s15  ;;  %s1001_s15 = scalar_lea.sflag (!%p192_p10), [#allocation4], %s226_s21 }
  0x13   : > { %s983_s28 = scalar_lea.vmem (!%p192_p10), [#allocation3], %s723_s27  ;;  %s797_s9 = sshll.u32 (!%p192_p10), %s875_s8, 4  ;;  %s798_s9 = int_to_ptr.vmem [resolvable:$false] %s797_s9 }
  0x14   : > { %686 = vmatpush3.bf16.msra.mxu0 (!%p192_p10), %v784_v2  ;;  %719 = vmatpush3.bf16.msra.mxu1 (!%p192_p10), %v784_v2  ;;  %s799_s10 = scalar_lea.vmem (!%p192_p10), %s798_s9, 1280 }
  0x15   : > { %687 = vmatprep.subr.bf16.mxu0 (!%p192_p10), %v873_v1  ;;  %715 = vmatprep.subr.bf16.mxu1 (!%p192_p10), %v873_v1 }
  0x16   : > { %s1061_s30 = smov (!%p230_p11, %s229_s30), 19 }
  0x17   : > { %s603_s6 = sshll.u32 %s1061_s30, 2  ;;  %s488_s30 = sshll.u32 %s983_s28, 4  ;;  %s991_s30 = int_to_ptr.vmem [resolvable:$true] %s488_s30 }
  0x18   : > { %688 = vmatpush3.bf16.msra.mxu0 %v785_v3  ;;  %720 = vmatpush3.bf16.msra.mxu1 %v785_v3  ;;  %s236_s11 = scalar_lea.vmem %s1047_s0, %s603_s6  ;;  %s996_s6 = scalar_lea.hbm %s1050_s3, %s643_s29 }
  0x19   : > { %689 = vmatprep.subr.bf16.mxu0 %v873_v1  ;;  %716 = vmatprep.subr.bf16.mxu1 %v873_v1  ;;  %v788_v7 = vld [vmem:[%s236_s11] sm:$0xff]   ;;  %v789_v8 = vld [vmem:[%s236_s11 + $0x18] sm:$0xff]   ;;  %v790_v9 = vld [vmem:[%s236_s11 + $0x8] sm:$0xff]   ;;  %s793_s7 = scalar_lea.vmem %s991_s30, 640  ;;  %p800_p1 = scmp.lt.s32.totalorder %s991_s30, %s798_s9 }
  0x1a   : > { %v791_v10 = vld [vmem:[%s236_s11 + $0x20] sm:$0xff]   ;;  %v792_v11 = vld [vmem:[%s236_s11 + $0x10] sm:$0xff]   ;;  %p794_p12 = scmp.ne.s32.totalorder %s991_s30, %s793_s7  ;;  %p801_p2 = scmp.lt.s32.totalorder %s799_s10, %s793_s7 }
  0x1c   : > { %690 = vmatpush3.bf16.msra.mxu0 %v786_v4  ;;  %721 = vmatpush3.bf16.msra.mxu1 %v786_v4  ;;  %p795_p13 = pnand %p794_p12, %p938_p4  ;;  %p802_p3 = por %p801_p2, %p800_p1 }
  0x1d   : > { %691 = vmatprep.subr.bf16.mxu0 %v873_v1  ;;  %717 = vmatprep.subr.bf16.mxu1 %v873_v1 }
  0x1e   : > { %p796_p0 = pneg %p795_p13 }
  0x20   : > { %692 = vmatpush3.bf16.msra.mxu0 %v348_v6  ;;  %722 = vmatpush3.bf16.msra.mxu1 %v348_v6  ;;  %p803_p5 = pnand %p802_p3, %p796_p0 }
  0x23   : > { %694 = vmatmul.mubr.msk.bf16.vlgmr.msra.gmra.mrb[0].mxu0 %vm330_vm2, %v788_v7  ;;  %706 = vmatmul.mubr.msk.bf16.vlgmr.msra.gmra.mrb[0].mxu1 %vm330_vm2, %v789_v8 }
  0x24   : > { %697 = vmatprep.mubr.msk.bf16.mxu0 %vm874_vm0, %v873_v1  ;;  %709 = vmatprep.mubr.msk.bf16.mxu1 %vm874_vm0, %v873_v1 }
  0x2b   : > { %698 = vmatmul.mubr.msk.bf16.gmra.mrb[4].mxu0 %vm330_vm2, %v790_v9  ;;  %710 = vmatmul.mubr.msk.bf16.gmra.mrb[4].mxu1 %vm330_vm2, %v791_v10 }
  0x2c   : > { %701 = vmatprep.mubr.msk.bf16.mxu0 %vm874_vm0, %v873_v1 }
  0x33   : > { %702 = vmatmul.mubr.msk.bf16.gmra.mrb[8].mxu0 %vm330_vm2, %v792_v11 }
  0xf6   : > { %v384_v13 = vpop.f32.mrb[0].mxu0  ;;  %v408_v14 = vpop.f32.mrb[0].mxu1 }
  0xf7   : > { %v695_v15 = vpop.f32.mrb[1].mxu0  ;;  %v409_v16 = vadd.f32 %v604_v12, %v408_v14  ;;  %v707_v17 = vpop.f32.mrb[1].mxu1  ;;  %v385_v20 = vadd.f32 %v604_v12, %v384_v13 }
  0xf8   : > { %v387_v18 = vpop.f32.mrb[2].mxu0  ;;  %v411_v19 = vpop.f32.mrb[2].mxu1 }
  0xf9   : > { %v388_v21 = vadd.f32 %v604_v12, %v387_v18  ;;  %v696_v22 = vpop.f32.mrb[3].mxu0  ;;  %v412_v23 = vadd.f32 %v604_v12, %v411_v19  ;;  %v708_v24 = vpop.f32.mrb[3].mxu1 }
  0xfb   : > { %v647_v25 = vpack.c.bf16 %v388_v21, %v385_v20  ;;  %v662_v26 = vpack.c.bf16 %v412_v23, %v409_v16 }
  0xfd   : > { %648 = vst [vmem:[%s983_s28] sm:$0xff] %v647_v25   ;;  %671 = vst [vmem:[%s983_s28 + $0x18] sm:$0xff] %v662_v26  }
  0xfe   : > { %v392_v27 = vpop.f32.mrb[4].mxu0  ;;  %v416_v28 = vpop.f32.mrb[4].mxu1 }
  0xff   : > { %v699_v29 = vpop.f32.mrb[5].mxu0  ;;  %v417_v30 = vadd.f32 %v604_v12, %v416_v28  ;;  %v711_v31 = vpop.f32.mrb[5].mxu1  ;;  %v393_v34 = vadd.f32 %v604_v12, %v392_v27 }
 0x100   : > { %v395_v32 = vpop.f32.mrb[6].mxu0  ;;  %v419_v33 = vpop.f32.mrb[6].mxu1 }
 0x101   : > { %v396_v35 = vadd.f32 %v604_v12, %v395_v32  ;;  %v700_v36 = vpop.f32.mrb[7].mxu0  ;;  %v420_v37 = vadd.f32 %v604_v12, %v419_v33  ;;  %v712_v38 = vpop.f32.mrb[7].mxu1 }
 0x103   : > { %v652_v39 = vpack.c.bf16 %v396_v35, %v393_v34  ;;  %v667_v40 = vpack.c.bf16 %v420_v37, %v417_v30 }
 0x105   : > { %669 = vst [vmem:[%s983_s28 + $0x8] sm:$0xff] %v652_v39   ;;  %672 = vst [vmem:[%s983_s28 + $0x20] sm:$0xff] %v667_v40  }
 0x106   : > { %v400_v41 = vpop.f32.mrb[8].mxu0 }
 0x107   : > { %v703_v42 = vpop.f32.mrb[9].mxu0  ;;  %v401_v44 = vadd.f32 %v604_v12, %v400_v41 }
 0x108   : > { %v403_v43 = vpop.f32.mrb[10].mxu0 }
 0x109   : > { %v404_v45 = vadd.f32 %v604_v12, %v403_v43  ;;  %v704_v46 = vpop.f32.mrb[11].mxu0 }
 0x10b   : > { %v657_v47 = vpack.c.bf16 %v404_v45, %v401_v44 }
 0x10d   : > { %670 = vst [vmem:[%s983_s28 + $0x10] sm:$0xff] %v657_v47  }
 0x10e   : > { %806 = shalt.err (!%p803_p5)
}
 0x10f   : > { %s807_s11 = scalar_lea.hbm %s996_s6, 640  ;;  %s811_s21 = scalar_lea.hbm %s1050_s3, 1280 }
 0x110   : > { %p808_p6 = scmp.ne.s32.totalorder %s996_s6, %s807_s11  ;;  %p812_p10 = scmp.lt.u32.totalorder %s996_s6, %s1050_s3 }
 0x111   : > { %p813_p11 = scmp.lt.u32.totalorder %s811_s21, %s807_s11  ;;  %p815_p13 = scmp.lt.u32.totalorder %s807_s11, %s996_s6 }
 0x112   : > { %p809_p7 = pnand %p808_p6, %p938_p4 }
 0x113   : > { %p814_p12 = por %p813_p11, %p812_p10 }
 0x114   : > { %p810_p9 = pneg %p809_p7 }
 0x115   : > { %p816_p0 = por %p815_p13, %p814_p12 }
 0x117   : > { %p817_p1 = pnand %p816_p0, %p810_p9 }
 0x119   : > { %820 = shalt.err (!%p817_p1)
}
 0x11a   : > { %s876_s27 = smov 64   ;;  %s877_s28 = smov 4  }
 0x11b   : > { %724 = dma.vmem_to_hbm [thread:$0]  (%p938_p4), %s991_s30, 640, %s996_s6, %s1001_s15, %s876_s27, %s876_s27, %s877_s28  }
 0x11c PF: > { %p730_p2 = scmp.ge.s32.totalorder %s871_s17, 2  ;;  %s503_s29 = sand.u32 1, %s851_s12  }
 0x11d   : > { %s504_s4 = scalar_lea.sflag [#allocation4], %s503_s29 }
 0x11e   : > { %p727_p3 = pnand %p730_p2, %p945_p8 }
 0x120   : > { %846 = dma.done.wait (!%p727_p3), %s504_s4, 640  }
 0x121   : > { %848 = vsyncadd (!%p727_p3), %s504_s4, 4294966656  ;;  %s16_s17 = sadd.s32 1, %s871_s17   ;;  %s1053_s12 = smov %s855_s13 }
 0x122   : > { %p13_p5 = scmp.ge.s32.totalorder %s16_s17, 4   ;;  %s1054_s13 = smov %s859_s14 }
 0x123   : > { %s1055_s14 = smov %s951_s25  ;;  %s1056_s15 = smov %s867_s16 }
 0x124   : > { %s1057_s16 = smov %s1059_s20  ;;  %15 = sbr.rel (!%p13_p5) target bundleno = 4 (0x4), region = 73 }
 0x12b   :  { %509 = vsyncpa [#allocation4], 1 }
 0x12c   :  { %511 = vsyncpa [#allocation4 + $0x1], 1 }

</bundles_post_ra>
